<compile_context>
chip_gen: v7x
topology: tpu7x:2x2x1
jax: 0.10.0
libtpu: 0.0.40
codegen_flags: <defaults>
</compile_context>

<pallas_src>
import math
from functools import partial

import jax
import jax.numpy as jnp
from jax.experimental import pallas as pl
from jax.experimental.pallas import tpu as pltpu


def _round_up(x, m):
    return ((x + m - 1) // m) * m


def _mlp_probe_kernel(*refs, n_layers, compute_dtype):
    """Fused MLP forward for one (TB, F) batch tile.

    refs = (x, w1, b1, ..., wn, bn, sig_out, logit_out).
    Dot inputs are `compute_dtype` (bf16) for the MXU; accumulation, bias add,
    ReLU and sigmoid are f32.
    """
    x_ref = refs[0]
    param_refs = refs[1:1 + 2 * n_layers]
    sig_ref, logit_ref = refs[1 + 2 * n_layers], refs[2 + 2 * n_layers]

    h = x_ref[...]                                       # (TB, F_in_pad) compute_dtype
    acc = None
    for li in range(n_layers):
        w = param_refs[2 * li][...]                      # (F_prev_pad, F_next_pad) compute_dtype
        b = param_refs[2 * li + 1][...]                  # (1, F_next_pad) f32
        acc = jnp.dot(h, w, preferred_element_type=jnp.float32) + b
        if li < n_layers - 1:
            # ReLU in f32 on the VPU; dropout is identity at inference time.
            h = jnp.maximum(acc, 0.0).astype(compute_dtype)

    logit_ref[...] = acc.astype(logit_ref.dtype)
    sig_ref[...] = jax.nn.sigmoid(acc).astype(sig_ref.dtype)   # exp + recip on the EUP


def transcriber_probe_forward(x, params, *, compute_dtype=jnp.bfloat16, batch_tile=512):
    """x: (B, 1, in_features) float32.  params: list of (W (F_in, F_out), b (1, F_out)) f32.

    Returns (sigmoid(logits), logits), each (B, n_outputs) float32 — the eval-mode
    forward of TranscriberProbe (dropout omitted: inference-only path).
    """
    x2d = jnp.squeeze(x, axis=1)                         # mirror x.squeeze(1)
    B, f_in = x2d.shape
    n_layers = len(params)
    n_out = params[-1][0].shape[1]

    # --- pad every feature dim to a lane-dense multiple of 128 -------------------
    sizes = [f_in] + [w.shape[1] for w, _ in params]
    padded = [_round_up(s, 128) for s in sizes]

    # --- batch tile: as large as reasonable, padded batch is a multiple of it ----
    tb = min(batch_tile, _round_up(B, 8))
    b_pad = _round_up(B, tb)
    grid = (b_pad // tb,)

    x_p = jnp.zeros((b_pad, padded[0]), compute_dtype)
    x_p = x_p.at[:B, :f_in].set(x2d.astype(compute_dtype))

    flat_params = []
    in_specs = [pl.BlockSpec((tb, padded[0]), lambda i: (i, 0))]
    for li, (w, b) in enumerate(params):
        pin, pout = padded[li], padded[li + 1]
        w_p = jnp.zeros((pin, pout), compute_dtype)
        w_p = w_p.at[:w.shape[0], :w.shape[1]].set(w.astype(compute_dtype))
        b_p = jnp.zeros((1, pout), jnp.float32)
        b_p = b_p.at[:, :b.shape[1]].set(b.astype(jnp.float32))
        flat_params.extend([w_p, b_p])
        # Weights/biases are grid-invariant (constant index_map) -> stay VMEM-resident;
        # on v7x one could add pipeline_mode=pl.Buffered(1) to halve their VMEM footprint.
        in_specs.append(pl.BlockSpec((pin, pout), lambda i: (0, 0)))
        in_specs.append(pl.BlockSpec((1, pout), lambda i: (0, 0)))

    n_out_pad = padded[-1]
    out_specs = [
        pl.BlockSpec((tb, n_out_pad), lambda i: (i, 0)),
        pl.BlockSpec((tb, n_out_pad), lambda i: (i, 0)),
    ]
    out_shape = (
        jax.ShapeDtypeStruct((b_pad, n_out_pad), jnp.float32),
        jax.ShapeDtypeStruct((b_pad, n_out_pad), jnp.float32),
    )

    kernel = partial(_mlp_probe_kernel, n_layers=n_layers, compute_dtype=compute_dtype)

    sig_p, logits_p = pl.pallas_call(
        kernel,
        out_shape=out_shape,
        grid=grid,
        in_specs=in_specs,
        out_specs=out_specs,
        compiler_params=pltpu.CompilerParams(
            dimension_semantics=("parallel",),   # batch tiles shard across both TCs on v7x
        ),
    )(x_p, *flat_params)

    return sig_p[:B, :n_out], logits_p[:B, :n_out]


def init_probe_params(key, in_features, n_outputs, hidden_units):
    """Xavier-uniform with gain=calculate_gain('relu')=sqrt(2); zero biases (init_weights)."""
    layer_sizes = [in_features] + list(hidden_units) + [n_outputs]
    gain = math.sqrt(2.0)
    params = []
    for i in range(len(layer_sizes) - 1):
        fan_in, fan_out = layer_sizes[i], layer_sizes[i + 1]
        key, sub = jax.random.split(key)
        limit = gain * math.sqrt(6.0 / (fan_in + fan_out))
        w = jax.random.uniform(sub, (fan_in, fan_out), jnp.float32, -limit, limit)
        b = jnp.zeros((1, fan_out), jnp.float32)
        params.append((w, b))
    return params


def _reference_forward_f32(x, params):
    """Pure-JAX f32 reference of the PyTorch forward (eval mode)."""
    h = jnp.squeeze(x, axis=1)
    for i, (w, b) in enumerate(params):
        h = h @ w + b
        if i < len(params) - 1:
            h = jnp.maximum(h, 0.0)
    return jax.nn.sigmoid(h), h


def _reference_forward_mixed(x, params, compute_dtype=jnp.bfloat16):
    """Reference with the same bf16-dot / f32-accumulate numerics as the kernel."""
    h = jnp.squeeze(x, axis=1).astype(compute_dtype)
    for i, (w, b) in enumerate(params):
        h = jnp.dot(h, w.astype(compute_dtype), preferred_element_type=jnp.float32) + b
        if i < len(params) - 1:
            h = jnp.maximum(h, 0.0).astype(compute_dtype)
    return jax.nn.sigmoid(h), h


if __name__ == "__main__":
    key = jax.random.PRNGKey(0)

    # TODO(synk): nn.Dropout (dropout_flag=True) is identity at eval time; training-mode
    # dropout is not emitted — this kernel is an inference-only forward pass.
    B, in_features, n_outputs = 2, 32, 16
    hidden_units = [64]

    key, kx, kp = jax.random.split(key, 3)
    x = jax.random.normal(kx, (B, 1, in_features), jnp.float32)
    params = init_probe_params(kp, in_features, n_outputs, hidden_units)

    sig, logits = transcriber_probe_forward(x, params)
    jax.block_until_ready((sig, logits))

    # Bit-level check against a reference with identical bf16/f32 mixed numerics.
    ref_sig_m, ref_logits_m = _reference_forward_mixed(x, params)
    assert jnp.allclose(logits, ref_logits_m, atol=2e-3, rtol=2e-3)
    assert jnp.allclose(sig, ref_sig_m, atol=2e-3, rtol=2e-3)

    # Semantic check against the pure-f32 PyTorch-equivalent forward (bf16 weight tolerance).
    ref_sig, ref_logits = _reference_forward_f32(x, params)
    assert jnp.allclose(logits, ref_logits, atol=5e-2, rtol=5e-2)
    assert jnp.allclose(sig, ref_sig, atol=5e-2, rtol=5e-2)

    print("KERNEL_OK")
</pallas_src>

<mosaic_0001>
module attributes {stable_mosaic.version = 11 : i64} {
  func.func @_mlp_probe_kernel(%arg0: i32, %arg1: memref<8x128xbf16, #tpu.memory_space<vmem>>, %arg2: memref<128x128xbf16, #tpu.memory_space<vmem>>, %arg3: memref<1x128xf32, #tpu.memory_space<vmem>>, %arg4: memref<128x128xbf16, #tpu.memory_space<vmem>>, %arg5: memref<1x128xf32, #tpu.memory_space<vmem>>, %arg6: memref<8x128xf32, #tpu.memory_space<vmem>>, %arg7: memref<8x128xf32, #tpu.memory_space<vmem>>) attributes {dimension_semantics = [#tpu.dimension_semantics<parallel>], iteration_bounds = array<i64: 1>, scalar_prefetch = 0 : i64, scratch_operands = 0 : i64, tpu.core_type = #tpu.core_type<tc>, window_params = [{transform_indices = @transform_0, window_bounds = array<i64: 8, 128>}, {pipeline_mode = #tpu.pipeline_mode<synchronous>, transform_indices = @transform_1, window_bounds = array<i64: 128, 128>}, {pipeline_mode = #tpu.pipeline_mode<synchronous>, transform_indices = @transform_2, window_bounds = array<i64: 1, 128>}, {pipeline_mode = #tpu.pipeline_mode<synchronous>, transform_indices = @transform_3, window_bounds = array<i64: 128, 128>}, {pipeline_mode = #tpu.pipeline_mode<synchronous>, transform_indices = @transform_4, window_bounds = array<i64: 1, 128>}, {transform_indices = @transform_5, window_bounds = array<i64: 8, 128>}, {transform_indices = @transform_6, window_bounds = array<i64: 8, 128>}]} {
    %c0 = arith.constant 0 : index
    %c0_0 = arith.constant 0 : index
    %0 = vector.load %arg1[%c0, %c0_0] : memref<8x128xbf16, #tpu.memory_space<vmem>>, vector<8x128xbf16>
    %c0_1 = arith.constant 0 : index
    %c0_2 = arith.constant 0 : index
    %1 = vector.load %arg2[%c0_1, %c0_2] : memref<128x128xbf16, #tpu.memory_space<vmem>>, vector<128x128xbf16>
    %c0_3 = arith.constant 0 : index
    %c0_4 = arith.constant 0 : index
    %2 = vector.load %arg3[%c0_3, %c0_4] : memref<1x128xf32, #tpu.memory_space<vmem>>, vector<1x128xf32>
    %cst = arith.constant dense<0.000000e+00> : vector<8x128xf32>
    %3 = tpu.matmul %0, %1, %cst {dimension_numbers = #tpu.dot_dimension_numbers<[1], [0], [0], [1], [0, 0, 1, 1], [], []>} : vector<8x128xbf16>, vector<128x128xbf16>, vector<8x128xf32> -> vector<8x128xf32>
    %4 = vector.broadcast %2 : vector<1x128xf32> to vector<8x128xf32>
    %5 = arith.addf %3, %4 : vector<8x128xf32>
    %cst_5 = arith.constant 0.000000e+00 : f32
    %6 = vector.broadcast %cst_5 : f32 to vector<8x128xf32>
    %7 = arith.maximumf %5, %6 : vector<8x128xf32>
    %8 = arith.truncf %7 : vector<8x128xf32> to vector<8x128xbf16>
    %c0_6 = arith.constant 0 : index
    %c0_7 = arith.constant 0 : index
    %9 = vector.load %arg4[%c0_6, %c0_7] : memref<128x128xbf16, #tpu.memory_space<vmem>>, vector<128x128xbf16>
    %c0_8 = arith.constant 0 : index
    %c0_9 = arith.constant 0 : index
    %10 = vector.load %arg5[%c0_8, %c0_9] : memref<1x128xf32, #tpu.memory_space<vmem>>, vector<1x128xf32>
    %cst_10 = arith.constant dense<0.000000e+00> : vector<8x128xf32>
    %11 = tpu.matmul %8, %9, %cst_10 {dimension_numbers = #tpu.dot_dimension_numbers<[1], [0], [0], [1], [0, 0, 1, 1], [], []>} : vector<8x128xbf16>, vector<128x128xbf16>, vector<8x128xf32> -> vector<8x128xf32>
    %12 = vector.broadcast %10 : vector<1x128xf32> to vector<8x128xf32>
    %13 = arith.addf %11, %12 : vector<8x128xf32>
    %c0_11 = arith.constant 0 : index
    %c0_12 = arith.constant 0 : index
    %14 = vector.load %arg7[%c0_11, %c0_12] : memref<8x128xf32, #tpu.memory_space<vmem>>, vector<8x128xf32>
    tpu.vector_store %arg7[%c0_11, %c0_12], %13 {strides = array<i32>} : memref<8x128xf32, #tpu.memory_space<vmem>>, vector<8x128xf32>,
    %15 = arith.negf %13 : vector<8x128xf32>
    %16 = math.exp %15 : vector<8x128xf32>
    %cst_13 = arith.constant 1.000000e+00 : f32
    %17 = vector.broadcast %cst_13 : f32 to vector<8x128xf32>
    %18 = arith.addf %17, %16 : vector<8x128xf32>
    %19 = arith.divf %17, %18 : vector<8x128xf32>
    %c0_14 = arith.constant 0 : index
    %c0_15 = arith.constant 0 : index
    %20 = vector.load %arg6[%c0_14, %c0_15] : memref<8x128xf32, #tpu.memory_space<vmem>>, vector<8x128xf32>
    tpu.vector_store %arg6[%c0_14, %c0_15], %19 {strides = array<i32>} : memref<8x128xf32, #tpu.memory_space<vmem>>, vector<8x128xf32>,
    return
  }
  func.func @transform_0(%arg0: i32) -> (i32, i32) {
    %c0_i32 = arith.constant 0 : i32
    %c0_i32_0 = arith.constant 0 : i32
    return %arg0, %c0_i32 : i32, i32
  }
  func.func @transform_1(%arg0: i32) -> (i32, i32) {
    %c0_i32 = arith.constant 0 : i32
    %c0_i32_0 = arith.constant 0 : i32
    %c0_i32_1 = arith.constant 0 : i32
    return %c0_i32, %c0_i32_0 : i32, i32
  }
  func.func @transform_2(%arg0: i32) -> (i32, i32) {
    %c0_i32 = arith.constant 0 : i32
    %c0_i32_0 = arith.constant 0 : i32
    %c0_i32_1 = arith.constant 0 : i32
    return %c0_i32, %c0_i32_0 : i32, i32
  }
  func.func @transform_3(%arg0: i32) -> (i32, i32) {
    %c0_i32 = arith.constant 0 : i32
    %c0_i32_0 = arith.constant 0 : i32
    %c0_i32_1 = arith.constant 0 : i32
    return %c0_i32, %c0_i32_0 : i32, i32
  }
  func.func @transform_4(%arg0: i32) -> (i32, i32) {
    %c0_i32 = arith.constant 0 : i32
    %c0_i32_0 = arith.constant 0 : i32
    %c0_i32_1 = arith.constant 0 : i32
    return %c0_i32, %c0_i32_0 : i32, i32
  }
  func.func @transform_5(%arg0: i32) -> (i32, i32) {
    %c0_i32 = arith.constant 0 : i32
    %c0_i32_0 = arith.constant 0 : i32
    return %arg0, %c0_i32 : i32, i32
  }
  func.func @transform_6(%arg0: i32) -> (i32, i32) {
    %c0_i32 = arith.constant 0 : i32
    %c0_i32_0 = arith.constant 0 : i32
    return %arg0, %c0_i32 : i32, i32
  }
}

</mosaic_0001>

<bundles_post_ra>
// kernel: tpu_custom_call.1
= control target key start
LH: loop header
LB: loop body
LE: loop exit
PB: predicated region body
PF: predicated region fallthrough
CT: control target
= control target key end

     0   :  { %12 = vsyncpa [#allocation3], 0  ;;  %s667_s0 = inlined_call_operand.hbm [shape: bf16[8,128], index: 0, kind: input, shape index: {}]   ;;  %s668_s1 = inlined_call_operand.hbm [shape: bf16[128,128], index: 1, kind: input, shape index: {}]   ;;  %s669_s2 = inlined_call_operand.vmem [shape: f32[1,128], index: 2, kind: input, shape index: {}]   ;;  %s670_s3 = inlined_call_operand.hbm [shape: bf16[128,128], index: 3, kind: input, shape index: {}]   ;;  %s671_s4 = inlined_call_operand.vmem [shape: f32[1,128], index: 4, kind: input, shape index: {}]   ;;  %s672_s5 = inlined_call_operand.hbm [shape: f32[8,128], index: 5, kind: output, shape index: {0}]   ;;  %s673_s6 = inlined_call_operand.hbm [shape: f32[8,128], index: 6, kind: output, shape index: {1}]  }
   0x1   :  { %13 = vsyncpa [#allocation6], 0 }
   0x2   :  { %14 = vsyncpa [#allocation4], 0 }
   0x3   :  { %15 = vsyncpa [#allocation10], 0  ;;  %s551_s21 = smov [#allocation5]   ;;  %s433_s25 = scalar_lea.hbm %s668_s1, 1024 }
   0x4   :  { %s31_s22 = sshll.u32 %s551_s21, 4  ;;  %p434_p0 = scmp.ne.s32.totalorder %s668_s1, %s433_s25  ;;  %s32_s22 = int_to_ptr.vmem [resolvable:$true] %s31_s22 }
   0x5   :  { %p437_p1 = scmp.lt.u32.totalorder %s433_s25, %s668_s1 }
   0x7   :  { %p439_p2 = pnand %p437_p1, %p434_p0 }
   0x9   :  { %442 = shalt.err (!%p439_p2)
}
   0xa   :  { %s443_s30 = scalar_lea.vmem %s32_s22, 1024  ;;  %p448_p4 = scmp.lt.s32.totalorder %s32_s22, %s32_s22 }
   0xb   :  { %p444_p3 = scmp.ne.s32.totalorder %s32_s22, %s443_s30  ;;  %p449_p5 = scmp.lt.s32.totalorder %s443_s30, %s443_s30 }
   0xd   :  { %p450_p6 = por %p449_p5, %p448_p4 }
   0xf   :  { %p451_p7 = pnand %p450_p6, %p444_p3 }
  0x11   :  { %454 = shalt.err (!%p451_p7)
}
  0x12   :  { %s552_s7 = smov 64   ;;  %s553_s8 = smov 4  }
  0x13   :  { %37 = dma.hbm_to_vmem [thread:$0]  %s668_s1, 1024, %s32_s22, [#allocation6], %s552_s7, %s552_s7, %s553_s8  }
  0x14   :  { %s554_s11 = smov [#allocation2]   ;;  %s555_s13 = smov [#allocation7]  }
  0x15   :  { %s22_s12 = sshll.u32 %s554_s11, 4  ;;  %s45_s14 = sshll.u32 %s555_s13, 4  ;;  %s23_s12 = int_to_ptr.vmem [resolvable:$true] %s22_s12  ;;  %s46_s14 = int_to_ptr.vmem [resolvable:$true] %s45_s14 }
  0x16   :  { %s455_s17 = scalar_lea.hbm %s667_s0, 64 }
  0x17   :  { %p456_p8 = scmp.ne.s32.totalorder %s667_s0, %s455_s17  ;;  %p459_p9 = scmp.lt.u32.totalorder %s455_s17, %s667_s0 }
  0x19   :  { %p461_p10 = pnand %p459_p9, %p456_p8 }
  0x1b   :  { %464 = shalt.err (!%p461_p10)
}
  0x1c   :  { %s465_s1 = scalar_lea.vmem %s23_s12, 64  ;;  %p470_p12 = scmp.lt.s32.totalorder %s23_s12, %s23_s12 }
  0x1d   :  { %p466_p11 = scmp.ne.s32.totalorder %s23_s12, %s465_s1  ;;  %p471_p13 = scmp.lt.s32.totalorder %s465_s1, %s465_s1 }
  0x1f   :  { %p472_p0 = por %p471_p13, %p470_p12 }
  0x21   :  { %p473_p1 = pnand %p472_p0, %p466_p11 }
  0x23   :  { %476 = shalt.err (!%p473_p1)
}
  0x24   :  { %25 = dma.hbm_to_vmem [thread:$0]  %s667_s0, 64, %s23_s12, [#allocation3]  }
  0x25   :  { %s477_s26 = scalar_lea.hbm %s670_s3, 1024 }
  0x26   :  { %p478_p2 = scmp.ne.s32.totalorder %s670_s3, %s477_s26  ;;  %p481_p3 = scmp.lt.u32.totalorder %s477_s26, %s670_s3 }
  0x28   :  { %p483_p4 = pnand %p481_p3, %p478_p2 }
  0x2a   :  { %486 = shalt.err (!%p483_p4)
}
  0x2b   :  { %s487_s9 = scalar_lea.vmem %s46_s14, 1024  ;;  %p492_p6 = scmp.lt.s32.totalorder %s46_s14, %s46_s14 }
  0x2c   :  { %p488_p5 = scmp.ne.s32.totalorder %s46_s14, %s487_s9  ;;  %p493_p7 = scmp.lt.s32.totalorder %s487_s9, %s487_s9 }
  0x2e   :  { %p494_p8 = por %p493_p7, %p492_p6 }
  0x30   :  { %p495_p9 = pnand %p494_p8, %p488_p5 }
  0x32   :  { %498 = shalt.err (!%p495_p9)
}
  0x33   :  { %51 = dma.hbm_to_vmem [thread:$0]  %s670_s3, 1024, %s46_s14, [#allocation6], %s552_s7, %s552_s7, %s553_s8  }
  0x34   :  { %543 = dma.done.wait [#allocation3], 64  }
  0x35   :  { %544 = vsyncadd [#allocation3], 4294967232 }
  0x36   :  { %545 = dma.done.wait [#allocation6], 2048  }
  0x37   :  { %546 = vsyncadd [#allocation6], 4294965248  ;;  %v556_v0 = vmov 0.0   ;;  %vm557_vm0 = vmmov 0   ;;  %v413_v1 = vld [vmem:[#allocation5] sm:$0xff]   ;;  %v414_v2 = vld [vmem:[#allocation5 + $0x8] sm:$0xff]  }
  0x38   :  { %364 = vmatprep.subr.bf16.mxu0 %v556_v0  ;;  %380 = vmatprep.mubr.msk.bf16.mxu0 %vm557_vm0, %v556_v0  ;;  %v415_v3 = vld [vmem:[#allocation5 + $0x10] sm:$0xff]   ;;  %v421_v4 = vld [vmem:[#allocation7] sm:$0xff]   ;;  %v416_v5 = vld [vmem:[#allocation5 + $0x18] sm:$0xff]   ;;  %s558_s12 = smov [#allocation9]  }
  0x39   :  { %384 = vmatprep.subr.bf16.mxu1 %v556_v0  ;;  %400 = vmatprep.mubr.msk.bf16.mxu1 %vm557_vm0, %v556_v0  ;;  %v422_v6 = vld [vmem:[#allocation7 + $0x8] sm:$0xff]   ;;  %v417_v7 = vld [vmem:[#allocation5 + $0x20] sm:$0xff]   ;;  %v423_v8 = vld [vmem:[#allocation7 + $0x10] sm:$0xff]   ;;  %s313_s13 = sshll.u32 %s558_s12, 4  ;;  %s314_s13 = int_to_ptr.vmem [resolvable:$true] %s313_s13 }
  0x3a   :  { %365 = vmatpush3.bf16.msra.mxu0 %v413_v1  ;;  %385 = vmatpush3.bf16.msra.mxu1 %v421_v4  ;;  %v418_v9 = vld [vmem:[#allocation5 + $0x28] sm:$0xff]   ;;  %v424_v10 = vld [vmem:[#allocation7 + $0x18] sm:$0xff]   ;;  %v419_v11 = vld [vmem:[#allocation5 + $0x30] sm:$0xff]   ;;  %p504_p11 = scmp.lt.s32.totalorder %s314_s13, %s314_s13 }
  0x3b   :  { %366 = vmatprep.subr.bf16.mxu0 %v556_v0  ;;  %386 = vmatprep.subr.bf16.mxu1 %v556_v0  ;;  %v425_v12 = vld [vmem:[#allocation7 + $0x20] sm:$0xff]   ;;  %v420_v13 = vld [vmem:[#allocation5 + $0x38] sm:$0xff]   ;;  %v426_v14 = vld [vmem:[#allocation7 + $0x28] sm:$0xff]  }
  0x3c   :  { %v64_v15 = vld [vmem:[#allocation2] sm:$0xf]  ;;  %v427_v16 = vld [vmem:[#allocation7 + $0x30] sm:$0xff]  }
  0x3d   :  { %v428_v17 = vld [vmem:[#allocation7 + $0x38] sm:$0xff]  }
  0x3e   :  { %367 = vmatpush3.bf16.msra.mxu0 %v414_v2  ;;  %387 = vmatpush3.bf16.msra.mxu1 %v422_v6  ;;  %v327_v18 = vld [vmem:[%s669_s2] ss:$0 sm:$0xff]  ;;  %s499_s2 = scalar_lea.vmem %s314_s13, 128 }
  0x3f   :  { %368 = vmatprep.subr.bf16.mxu0 %v556_v0  ;;  %388 = vmatprep.subr.bf16.mxu1 %v556_v0  ;;  %v336_v26 = vld [vmem:[%s671_s4] ss:$0 sm:$0xff]  ;;  %p500_p10 = scmp.ne.s32.totalorder %s314_s13, %s499_s2  ;;  %p505_p12 = scmp.lt.s32.totalorder %s499_s2, %s499_s2 }
  0x41   :  { %p506_p13 = por %p505_p12, %p504_p11 }
  0x42   :  { %369 = vmatpush3.bf16.msra.mxu0 %v415_v3  ;;  %389 = vmatpush3.bf16.msra.mxu1 %v423_v8 }
  0x43   :  { %370 = vmatprep.subr.bf16.mxu0 %v556_v0  ;;  %390 = vmatprep.subr.bf16.mxu1 %v556_v0  ;;  %p507_p0 = pnand %p506_p13, %p500_p10 }
  0x46   :  { %371 = vmatpush3.bf16.msra.mxu0 %v416_v5  ;;  %391 = vmatpush3.bf16.msra.mxu1 %v424_v10 }
  0x47   :  { %372 = vmatprep.subr.bf16.mxu0 %v556_v0  ;;  %392 = vmatprep.subr.bf16.mxu1 %v556_v0 }
  0x4a   :  { %373 = vmatpush3.bf16.msra.mxu0 %v417_v7  ;;  %393 = vmatpush3.bf16.msra.mxu1 %v425_v12 }
  0x4b   :  { %374 = vmatprep.subr.bf16.mxu0 %v556_v0  ;;  %394 = vmatprep.subr.bf16.mxu1 %v556_v0 }
  0x4e   :  { %375 = vmatpush3.bf16.msra.mxu0 %v418_v9  ;;  %395 = vmatpush3.bf16.msra.mxu1 %v426_v14 }
  0x4f   :  { %376 = vmatprep.subr.bf16.mxu0 %v556_v0  ;;  %396 = vmatprep.subr.bf16.mxu1 %v556_v0 }
  0x52   :  { %377 = vmatpush3.bf16.msra.mxu0 %v419_v11  ;;  %397 = vmatpush3.bf16.msra.mxu1 %v427_v16 }
  0x53   :  { %378 = vmatprep.subr.bf16.mxu0 %v556_v0  ;;  %398 = vmatprep.subr.bf16.mxu1 %v556_v0 }
  0x56   :  { %379 = vmatpush3.bf16.msra.mxu0 %v420_v13  ;;  %399 = vmatpush3.bf16.msra.mxu1 %v428_v17 }
  0x59   :  { %381 = vmatmul.mubr.bf16.vlgmr.msra.gmra.mrb[0].mxu0 %v64_v15 }
 0x12c   :  { %v170_v19 = vpop.f32.mrb[0].mxu0 }
 0x12d   :  { %v171_v20 = vadd.f32 %v327_v18, %v170_v19  ;;  %v382_v21 = vpop.f32.mrb[1].mxu0 }
 0x12e   :  { %v173_v22 = vpop.f32.mrb[2].mxu0 }
 0x12f   :  { %v176_v23 = vmax.f32 %v171_v20, 0.0  ;;  %v383_v24 = vpop.f32.mrb[3].mxu0 }
 0x131   :  { %v177_v25 = vpack.c.bf16 %v176_v23, %v176_v23 }
 0x133   :  { %401 = vmatmul.mubr.bf16.vlgmr.msra.gmra.mrb[0].mxu1 %v177_v25 }
 0x206   :  { %v283_v27 = vpop.f32.mrb[0].mxu1 }
 0x207   :  { %v284_v28 = vadd.f32 %v336_v26, %v283_v27  ;;  %v402_v29 = vpop.f32.mrb[1].mxu1 }
 0x208   :  { %v286_v30 = vpop.f32.mrb[2].mxu1 }
 0x209   :  { %v345_v31 = vmul.f32 -1.442695, %v284_v28  ;;  %289 = vst [vmem:[#allocation9] sm:$0xff] %v284_v28  ;;  %v403_v32 = vpop.f32.mrb[3].mxu1 }
 0x20a   :  { %510 = shalt.err (!%p507_p0)
}
 0x20b   :  { %s511_s4 = scalar_lea.hbm %s673_s6, 128 }
 0x20c   :  { %p512_p1 = scmp.ne.s32.totalorder %s673_s6, %s511_s4  ;;  %p515_p2 = scmp.lt.u32.totalorder %s511_s4, %s673_s6 }
 0x20e   :  { %p517_p3 = pnand %p515_p2, %p512_p1 }
 0x210   :  { %520 = shalt.err (!%p517_p3)
}
 0x211   :  { %316 = dma.vmem_to_hbm [thread:$0]  %s314_s13, 128, %s673_s6, [#allocation10]   ;;  %429 = vpow2.f32 %v345_v31 }
 0x212   :  { %s559_s1 = smov [#allocation8]  }
 0x213   :  { %s303_s22 = sshll.u32 %s559_s1, 4  ;;  %s304_s22 = int_to_ptr.vmem [resolvable:$true] %s303_s22 }
 0x214   :  { %s521_s23 = scalar_lea.vmem %s304_s22, 128  ;;  %p526_p5 = scmp.lt.s32.totalorder %s304_s22, %s304_s22 }
 0x215   :  { %p522_p4 = scmp.ne.s32.totalorder %s304_s22, %s521_s23  ;;  %p527_p6 = scmp.lt.s32.totalorder %s521_s23, %s521_s23 }
 0x217   :  { %p528_p7 = por %p527_p6, %p526_p5 }
 0x219   :  { %p529_p8 = pnand %p528_p7, %p522_p4 }
 0x21b   :  { %v430_v33 = vpop.eup %429 }
 0x21c   :  { %v293_v34 = vadd.f32 1.0, %v430_v33 }
 0x21e   :  { %431 = vrcp.f32 %v293_v34 }
 0x228   :  { %v432_v35 = vpop.eup %431 }
 0x229   :  { %296 = vst [vmem:[#allocation8] sm:$0xff] %v432_v35 }
 0x22a   :  { %532 = shalt.err (!%p529_p8)
}
 0x22b   :  { %s533_s6 = scalar_lea.hbm %s672_s5, 128 }
 0x22c   :  { %p534_p9 = scmp.ne.s32.totalorder %s672_s5, %s533_s6  ;;  %p537_p10 = scmp.lt.u32.totalorder %s533_s6, %s672_s5 }
 0x22e   :  { %p539_p11 = pnand %p537_p10, %p534_p9 }
 0x230   :  { %542 = shalt.err (!%p539_p11)
}
 0x231   :  { %306 = dma.vmem_to_hbm [thread:$0]  %s304_s22, 128, %s672_s5, [#allocation4]  }
 0x232   :  { %547 = dma.done.wait [#allocation4], 128  }
 0x233   :  { %548 = vsyncadd [#allocation4], 4294967168 }
 0x234   :  { %549 = dma.done.wait [#allocation10], 128  }
 0x235   :  { %550 = vsyncadd [#allocation10], 4294967168 }
 0x236   :  { %323 = vsyncpa [#allocation3], 1 }
 0x237   :  { %324 = vsyncpa [#allocation6], 1 }
 0x238   :  { %325 = vsyncpa [#allocation4], 1 }
 0x239   :  { %326 = vsyncpa [#allocation10], 1 }

</bundles_post_ra>
